<compile_context>
chip_gen: v6e
topology: v6e:2x2x1
jax: 0.10.0
libtpu: 0.0.40
codegen_flags: <defaults>
</compile_context>

<pallas_src>
import functools

import jax
import jax.numpy as jnp
from jax import lax
from jax.experimental import pallas as pl
from jax.experimental.pallas import tpu as pltpu


def _mlp_kernel(n_linear, sub_tm, *refs):
    """refs = (x_ref, w0, b0, w1, b1, ..., w_{L-1}, b_{L-1}, out_ref)."""
    x_ref = refs[0]
    out_ref = refs[-1]
    param_refs = refs[1:-1]
    assert len(param_refs) == 2 * n_linear

    n_chunks = x_ref.shape[0] // sub_tm  # static (wrapper guarantees divisibility)

    def chunk(c, carry):
        r = pl.multiple_of(c * sub_tm, sub_tm)
        h = x_ref[pl.ds(r, sub_tm), :]                      # (sub_tm, in) in compute dtype
        for i in range(n_linear):
            w = param_refs[2 * i][...]
            b = param_refs[2 * i + 1][...]
            acc = jnp.dot(h, w, preferred_element_type=jnp.float32)  # f32 MXU accumulation
            acc = acc + b.astype(jnp.float32)
            if i < n_linear - 1:
                # ReLU after every layer except the head; cast back to the compute dtype so
                # the next dot is a native (bf16) MXU pass.
                h = jnp.maximum(acc, 0.0).astype(w.dtype)
            else:
                h = acc
        out_ref[pl.ds(r, sub_tm), :] = h.astype(out_ref.dtype)
        return carry

    lax.fori_loop(0, n_chunks, chunk, 0, unroll=True)


def mlp_forward(x, params, *, tm=1024, min_steps=2, sub_tm=256,
                compute_dtype=jnp.bfloat16):
    """params: list of (W, b) with W: [in, out], b: [1, out]. Returns f32 [batch, out]."""
    n_linear = len(params)
    batch, in_dim = x.shape
    out_dim = params[-1][0].shape[1]

    # --- Narrow compute dtype (bf16): halves HBM read traffic; f32 accumulation in-kernel.
    x_c = x.astype(compute_dtype)
    cast_params = [(w.astype(compute_dtype), b.astype(compute_dtype)) for w, b in params]
    itemsize = x_c.dtype.itemsize

    # --- Batch tiling.  SUB=16 keeps row offsets aligned for both f32 (8) and bf16 (16)
    # sublane packing.  Guarantee >= min_steps grid steps (v7x megacore) when the batch
    # allows, cap the tile at `tm`, and bound padding by ~one tile.
    SUB = 16
    b_al = pl.cdiv(batch, SUB) * SUB
    steps = max(min_steps, pl.cdiv(b_al, tm))
    steps = max(1, min(steps, b_al // SUB))
    tm_eff = pl.cdiv(pl.cdiv(b_al, steps), SUB) * SUB
    padded_batch = pl.cdiv(b_al, tm_eff) * tm_eff
    grid = (padded_batch // tm_eff,)

    if padded_batch != batch:
        # Padded rows flow through the MLP but are never read back (row slice below).
        x_c = jnp.pad(x_c, ((0, padded_batch - batch), (0, 0)))

    # --- In-kernel sub-chunk: largest multiple of SUB that divides tm_eff and is <= sub_tm,
    # so per-layer activations stay in vregs instead of (TM, hidden) VMEM temporaries.
    sub_eff = SUB
    d = SUB
    while d <= min(sub_tm, tm_eff):
        if tm_eff % d == 0:
            sub_eff = d
        d += SUB

    # --- Specs: x/out are batch-tiled (double-buffered by the pipeline); weights/biases are
    # full-array, constant-index (VMEM-resident) and single-buffered.
    in_specs = [pl.BlockSpec((tm_eff, in_dim), lambda i: (i, 0))]
    flat_params = []
    for w, b in cast_params:
        flat_params.extend([w, b])
        in_specs.append(pl.BlockSpec(w.shape, lambda i: (0, 0),
                                     pipeline_mode=pl.Buffered(1)))
        in_specs.append(pl.BlockSpec(b.shape, lambda i: (0, 0),
                                     pipeline_mode=pl.Buffered(1)))
    # Last axis equals the full array dim (out_dim) -> legal block, no 128-lane zero padding.
    out_specs = pl.BlockSpec((tm_eff, out_dim), lambda i: (i, 0))

    # --- Cost estimate + scoped-VMEM sizing.
    param_bytes = sum((w.size + b.size) * itemsize for w, b in cast_params)
    flops = 2 * padded_batch * sum(w.shape[0] * w.shape[1] for w, _ in cast_params)
    bytes_accessed = (padded_batch * in_dim * itemsize + param_bytes
                      + padded_batch * out_dim * 4)
    max_width = max([in_dim] + [w.shape[1] for w, _ in cast_params])
    needed = (param_bytes                                  # single-buffered resident params
              + 2 * tm_eff * in_dim * itemsize             # double-buffered x tiles
              + 2 * tm_eff * out_dim * 4                   # double-buffered out tiles
              + 4 * sub_eff * max_width * 4                # in-kernel activation temporaries
              + (4 << 20))                                 # Mosaic internal scratch slack
    vmem_limit = int(min(64 << 20, max(needed, 32 << 20)))  # stay under v7x 64 MiB physical

    kernel = functools.partial(_mlp_kernel, n_linear, sub_eff)
    out = pl.pallas_call(
        kernel,
        out_shape=jax.ShapeDtypeStruct((padded_batch, out_dim), jnp.float32),
        grid=grid,
        in_specs=in_specs,
        out_specs=out_specs,
        compiler_params=pltpu.CompilerParams(
            dimension_semantics=("parallel",),
            vmem_limit_bytes=vmem_limit),
        cost_estimate=pl.CostEstimate(
            flops=flops, transcendentals=0, bytes_accessed=bytes_accessed),
    )(x_c, *flat_params)

    if padded_batch != batch:
        out = out[:batch]
    return out


def init_params(key, input_size, hidden_size, output_size, n_layers):
    """Deterministic init matching the PyTorch module's layer shapes.

    NeuralNetwork builds n_layers+1 Linear layers:
      [input->hidden] + [hidden->hidden]*(n_layers-1) + [hidden->output]
    i.e. dims = [input] + [hidden]*n_layers + [output].
    PyTorch-Linear-style uniform(-1/sqrt(fan_in), 1/sqrt(fan_in)).
    """
    dims = [input_size] + [hidden_size] * n_layers + [output_size]
    params = []
    for i in range(len(dims) - 1):
        fan_in, fan_out = dims[i], dims[i + 1]
        key, kw, kb = jax.random.split(key, 3)
        bound = 1.0 / jnp.sqrt(jnp.float32(fan_in))
        w = jax.random.uniform(kw, (fan_in, fan_out), jnp.float32,
                               minval=-bound, maxval=bound)
        b = jax.random.uniform(kb, (1, fan_out), jnp.float32,
                               minval=-bound, maxval=bound)
        params.append((w, b))
    return params


def reference_forward(x, params, compute_dtype=jnp.float32):
    """Pure-JAX reference of the same math (optionally with the same bf16 casts)."""
    h = x.astype(compute_dtype)
    for i, (w, b) in enumerate(params):
        wc = w.astype(compute_dtype)
        bc = b.astype(compute_dtype)
        h = jnp.dot(h, wc, preferred_element_type=jnp.float32) + bc.astype(jnp.float32)
        if i < len(params) - 1:
            h = jnp.maximum(h, 0.0).astype(compute_dtype)
    return h


if __name__ == "__main__":
    # Module config (matches NeuralNetwork(input_size, hidden_size, output_size, n_layers)).
    input_size, hidden_size, output_size, n_layers = 16, 32, 4, 3
    batch = 20  # not a tile multiple -> exercises padding, multi-step grid, and row slice

    key = jax.random.PRNGKey(0)
    key, kx = jax.random.split(key)
    x = jax.random.normal(kx, (batch, input_size), dtype=jnp.float32)
    params = init_params(key, input_size, hidden_size, output_size, n_layers)

    out = jax.block_until_ready(mlp_forward(x, params))
    assert out.shape == (batch, output_size)

    # Same-math reference (bf16 inputs/weights, f32 accumulation) -> tight check.
    ref_bf16 = jax.block_until_ready(reference_forward(x, params, jnp.bfloat16))
    assert jnp.allclose(out, ref_bf16, atol=1e-2, rtol=1e-2), \
        float(jnp.max(jnp.abs(out - ref_bf16)))

    # Full-f32 reference (PyTorch semantics); loose tolerance accounts for the bf16 cast.
    ref_f32 = jax.block_until_ready(reference_forward(x, params, jnp.float32))
    assert jnp.allclose(out, ref_f32, atol=5e-2, rtol=5e-2), \
        float(jnp.max(jnp.abs(out - ref_f32)))

    print("KERNEL_OK")
</pallas_src>

<mosaic_0001>
module attributes {stable_mosaic.version = 11 : i64} {
  func.func @_mlp_kernel(%arg0: i32, %arg1: memref<16x16xbf16, #tpu.memory_space<vmem>>, %arg2: memref<16x32xbf16, #tpu.memory_space<vmem>>, %arg3: memref<1x32xbf16, #tpu.memory_space<vmem>>, %arg4: memref<32x32xbf16, #tpu.memory_space<vmem>>, %arg5: memref<1x32xbf16, #tpu.memory_space<vmem>>, %arg6: memref<32x32xbf16, #tpu.memory_space<vmem>>, %arg7: memref<1x32xbf16, #tpu.memory_space<vmem>>, %arg8: memref<32x4xbf16, #tpu.memory_space<vmem>>, %arg9: memref<1x4xbf16, #tpu.memory_space<vmem>>, %arg10: memref<16x4xf32, #tpu.memory_space<vmem>>) attributes {dimension_semantics = [#tpu.dimension_semantics<parallel>], iteration_bounds = array<i64: 2>, scalar_prefetch = 0 : i64, scratch_operands = 0 : i64, tpu.core_type = #tpu.core_type<tc>, window_params = [{transform_indices = @transform_0, window_bounds = array<i64: 16, 16>}, {pipeline_mode = #tpu.pipeline_mode<synchronous>, transform_indices = @transform_1, window_bounds = array<i64: 16, 32>}, {pipeline_mode = #tpu.pipeline_mode<synchronous>, transform_indices = @transform_2, window_bounds = array<i64: 1, 32>}, {pipeline_mode = #tpu.pipeline_mode<synchronous>, transform_indices = @transform_3, window_bounds = array<i64: 32, 32>}, {pipeline_mode = #tpu.pipeline_mode<synchronous>, transform_indices = @transform_4, window_bounds = array<i64: 1, 32>}, {pipeline_mode = #tpu.pipeline_mode<synchronous>, transform_indices = @transform_5, window_bounds = array<i64: 32, 32>}, {pipeline_mode = #tpu.pipeline_mode<synchronous>, transform_indices = @transform_6, window_bounds = array<i64: 1, 32>}, {pipeline_mode = #tpu.pipeline_mode<synchronous>, transform_indices = @transform_7, window_bounds = array<i64: 32, 4>}, {pipeline_mode = #tpu.pipeline_mode<synchronous>, transform_indices = @transform_8, window_bounds = array<i64: 1, 4>}, {transform_indices = @transform_9, window_bounds = array<i64: 16, 4>}]} {
    %c0_i32 = arith.constant 0 : i32
    %c16_i32 = arith.constant 16 : i32
    %0 = arith.muli %c0_i32, %c16_i32 : i32
    %1 = tpu.assume_multiple %0, 16 : i32
    %2 = arith.index_cast %1 : i32 to index
    %c0 = arith.constant 0 : index
    %3 = vector.load %arg1[%2, %c0] : memref<16x16xbf16, #tpu.memory_space<vmem>>, vector<16x16xbf16>
    %c0_0 = arith.constant 0 : index
    %c0_1 = arith.constant 0 : index
    %4 = vector.load %arg2[%c0_0, %c0_1] : memref<16x32xbf16, #tpu.memory_space<vmem>>, vector<16x32xbf16>
    %c0_2 = arith.constant 0 : index
    %c0_3 = arith.constant 0 : index
    %5 = vector.load %arg3[%c0_2, %c0_3] : memref<1x32xbf16, #tpu.memory_space<vmem>>, vector<1x32xbf16>
    %cst = arith.constant dense<0.000000e+00> : vector<16x32xf32>
    %6 = tpu.matmul %3, %4, %cst {dimension_numbers = #tpu.dot_dimension_numbers<[1], [0], [0], [1], [0, 0, 1, 1], [], []>} : vector<16x16xbf16>, vector<16x32xbf16>, vector<16x32xf32> -> vector<16x32xf32>
    %7 = arith.extf %5 : vector<1x32xbf16> to vector<1x32xf32>
    %8 = vector.broadcast %7 : vector<1x32xf32> to vector<16x32xf32>
    %9 = arith.addf %6, %8 : vector<16x32xf32>
    %cst_4 = arith.constant 0.000000e+00 : f32
    %10 = vector.broadcast %cst_4 : f32 to vector<16x32xf32>
    %11 = arith.maximumf %9, %10 : vector<16x32xf32>
    %12 = arith.truncf %11 : vector<16x32xf32> to vector<16x32xbf16>
    %c0_5 = arith.constant 0 : index
    %c0_6 = arith.constant 0 : index
    %13 = vector.load %arg4[%c0_5, %c0_6] : memref<32x32xbf16, #tpu.memory_space<vmem>>, vector<32x32xbf16>
    %c0_7 = arith.constant 0 : index
    %c0_8 = arith.constant 0 : index
    %14 = vector.load %arg5[%c0_7, %c0_8] : memref<1x32xbf16, #tpu.memory_space<vmem>>, vector<1x32xbf16>
    %cst_9 = arith.constant dense<0.000000e+00> : vector<16x32xf32>
    %15 = tpu.matmul %12, %13, %cst_9 {dimension_numbers = #tpu.dot_dimension_numbers<[1], [0], [0], [1], [0, 0, 1, 1], [], []>} : vector<16x32xbf16>, vector<32x32xbf16>, vector<16x32xf32> -> vector<16x32xf32>
    %16 = arith.extf %14 : vector<1x32xbf16> to vector<1x32xf32>
    %17 = vector.broadcast %16 : vector<1x32xf32> to vector<16x32xf32>
    %18 = arith.addf %15, %17 : vector<16x32xf32>
    %cst_10 = arith.constant 0.000000e+00 : f32
    %19 = vector.broadcast %cst_10 : f32 to vector<16x32xf32>
    %20 = arith.maximumf %18, %19 : vector<16x32xf32>
    %21 = arith.truncf %20 : vector<16x32xf32> to vector<16x32xbf16>
    %c0_11 = arith.constant 0 : index
    %c0_12 = arith.constant 0 : index
    %22 = vector.load %arg6[%c0_11, %c0_12] : memref<32x32xbf16, #tpu.memory_space<vmem>>, vector<32x32xbf16>
    %c0_13 = arith.constant 0 : index
    %c0_14 = arith.constant 0 : index
    %23 = vector.load %arg7[%c0_13, %c0_14] : memref<1x32xbf16, #tpu.memory_space<vmem>>, vector<1x32xbf16>
    %cst_15 = arith.constant dense<0.000000e+00> : vector<16x32xf32>
    %24 = tpu.matmul %21, %22, %cst_15 {dimension_numbers = #tpu.dot_dimension_numbers<[1], [0], [0], [1], [0, 0, 1, 1], [], []>} : vector<16x32xbf16>, vector<32x32xbf16>, vector<16x32xf32> -> vector<16x32xf32>
    %25 = arith.extf %23 : vector<1x32xbf16> to vector<1x32xf32>
    %26 = vector.broadcast %25 : vector<1x32xf32> to vector<16x32xf32>
    %27 = arith.addf %24, %26 : vector<16x32xf32>
    %cst_16 = arith.constant 0.000000e+00 : f32
    %28 = vector.broadcast %cst_16 : f32 to vector<16x32xf32>
    %29 = arith.maximumf %27, %28 : vector<16x32xf32>
    %30 = arith.truncf %29 : vector<16x32xf32> to vector<16x32xbf16>
    %c0_17 = arith.constant 0 : index
    %c0_18 = arith.constant 0 : index
    %31 = vector.load %arg8[%c0_17, %c0_18] : memref<32x4xbf16, #tpu.memory_space<vmem>>, vector<32x4xbf16>
    %c0_19 = arith.constant 0 : index
    %c0_20 = arith.constant 0 : index
    %32 = vector.load %arg9[%c0_19, %c0_20] : memref<1x4xbf16, #tpu.memory_space<vmem>>, vector<1x4xbf16>
    %cst_21 = arith.constant dense<0.000000e+00> : vector<16x4xf32>
    %33 = tpu.matmul %30, %31, %cst_21 {dimension_numbers = #tpu.dot_dimension_numbers<[1], [0], [0], [1], [0, 0, 1, 1], [], []>} : vector<16x32xbf16>, vector<32x4xbf16>, vector<16x4xf32> -> vector<16x4xf32>
    %34 = arith.extf %32 : vector<1x4xbf16> to vector<1x4xf32>
    %35 = vector.broadcast %34 : vector<1x4xf32> to vector<16x4xf32>
    %36 = arith.addf %33, %35 : vector<16x4xf32>
    %37 = arith.index_cast %1 : i32 to index
    %c0_22 = arith.constant 0 : index
    %38 = vector.load %arg10[%37, %c0_22] : memref<16x4xf32, #tpu.memory_space<vmem>>, vector<16x4xf32>
    tpu.vector_store %arg10[%37, %c0_22], %36 {strides = array<i32>} : memref<16x4xf32, #tpu.memory_space<vmem>>, vector<16x4xf32>,
    %c1_i32 = arith.constant 1 : i32
    return
  }
  func.func @transform_0(%arg0: i32) -> (i32, i32) {
    %c0_i32 = arith.constant 0 : i32
    %c0_i32_0 = arith.constant 0 : i32
    return %arg0, %c0_i32 : i32, i32
  }
  func.func @transform_1(%arg0: i32) -> (i32, i32) {
    %c0_i32 = arith.constant 0 : i32
    %c0_i32_0 = arith.constant 0 : i32
    %c0_i32_1 = arith.constant 0 : i32
    return %c0_i32, %c0_i32_0 : i32, i32
  }
  func.func @transform_2(%arg0: i32) -> (i32, i32) {
    %c0_i32 = arith.constant 0 : i32
    %c0_i32_0 = arith.constant 0 : i32
    %c0_i32_1 = arith.constant 0 : i32
    return %c0_i32, %c0_i32_0 : i32, i32
  }
  func.func @transform_3(%arg0: i32) -> (i32, i32) {
    %c0_i32 = arith.constant 0 : i32
    %c0_i32_0 = arith.constant 0 : i32
    %c0_i32_1 = arith.constant 0 : i32
    return %c0_i32, %c0_i32_0 : i32, i32
  }
  func.func @transform_4(%arg0: i32) -> (i32, i32) {
    %c0_i32 = arith.constant 0 : i32
    %c0_i32_0 = arith.constant 0 : i32
    %c0_i32_1 = arith.constant 0 : i32
    return %c0_i32, %c0_i32_0 : i32, i32
  }
  func.func @transform_5(%arg0: i32) -> (i32, i32) {
    %c0_i32 = arith.constant 0 : i32
    %c0_i32_0 = arith.constant 0 : i32
    %c0_i32_1 = arith.constant 0 : i32
    return %c0_i32, %c0_i32_0 : i32, i32
  }
  func.func @transform_6(%arg0: i32) -> (i32, i32) {
    %c0_i32 = arith.constant 0 : i32
    %c0_i32_0 = arith.constant 0 : i32
    %c0_i32_1 = arith.constant 0 : i32
    return %c0_i32, %c0_i32_0 : i32, i32
  }
  func.func @transform_7(%arg0: i32) -> (i32, i32) {
    %c0_i32 = arith.constant 0 : i32
    %c0_i32_0 = arith.constant 0 : i32
    %c0_i32_1 = arith.constant 0 : i32
    return %c0_i32, %c0_i32_0 : i32, i32
  }
  func.func @transform_8(%arg0: i32) -> (i32, i32) {
    %c0_i32 = arith.constant 0 : i32
    %c0_i32_0 = arith.constant 0 : i32
    %c0_i32_1 = arith.constant 0 : i32
    return %c0_i32, %c0_i32_0 : i32, i32
  }
  func.func @transform_9(%arg0: i32) -> (i32, i32) {
    %c0_i32 = arith.constant 0 : i32
    %c0_i32_0 = arith.constant 0 : i32
    return %arg0, %c0_i32 : i32, i32
  }
}

</mosaic_0001>

<bundles_post_ra>
// kernel: tpu_custom_call.1
= control target key start
LH: loop header
LB: loop body
LE: loop exit
PB: predicated region body
PF: predicated region fallthrough
CT: control target
= control target key end

     0   :  { %s812_s30 = smov 0   ;;  %s873_s0 = inlined_call_operand.vmem [shape: bf16[32,16], index: 0, kind: input, shape index: {}]   ;;  %s874_s1 = inlined_call_operand.vmem [shape: bf16[16,32], index: 1, kind: input, shape index: {}]   ;;  %s875_s2 = inlined_call_operand.vmem [shape: bf16[1,32], index: 2, kind: input, shape index: {}]   ;;  %s876_s3 = inlined_call_operand.vmem [shape: bf16[32,32], index: 3, kind: input, shape index: {}]   ;;  %s877_s4 = inlined_call_operand.vmem [shape: bf16[1,32], index: 4, kind: input, shape index: {}]   ;;  %s878_s5 = inlined_call_operand.vmem [shape: bf16[32,32], index: 5, kind: input, shape index: {}]   ;;  %s879_s6 = inlined_call_operand.vmem [shape: bf16[1,32], index: 6, kind: input, shape index: {}]   ;;  %s880_s7 = inlined_call_operand.vmem [shape: bf16[32,4], index: 7, kind: input, shape index: {}]   ;;  %s881_s8 = inlined_call_operand.vmem [shape: bf16[1,4], index: 8, kind: input, shape index: {}]   ;;  %s882_s9 = inlined_call_operand.vmem [shape: f32[32,4], index: 9, kind: output, shape index: {}]  }
   0x1 LB: > { %s670_s10 = sadd.s32 4294967295, %s758_s30   ;;  %p674_p0 = scmp.ge.s32.totalorder %s758_s30, 1  ;;  %s758_s30 = sphi %s812_s30, %s19_s30  }
   0x2   : > { %p288_p1 = scmp.lt.s32.totalorder %s758_s30, 3 }
   0x4   : > { %p289_p2 = pnand %p674_p0, %p288_p1 }
   0x5   : > { %s675_s13 = sshll.u32 (!%p289_p2), %s670_s10, 1 }
   0x6   : > { %292 = sbr.rel (%p289_p2) target bundleno = 825 (0x339), region = 56  ;;  %p325_p3 = scmp.lt.s32.totalorder (!%p289_p2), %s675_s13, 3 }
   0xb   : > { %v744_v0 = vld [vmem:[%s874_s1] sm:$0xff]   ;;  %v760_v1 = vmov 0.0   ;;  %vm761_vm0 = vmmov 0   ;;  %s884_s13 = smov (!%p325_p3, %s675_s13), 3  ;;  %vm358_vm1 = vcmask 130048   ;;  %v746_v3 = vld [vmem:[%s876_s3 + $0x8] sm:$0xff]   ;;  %v343_v5 = vlaneseq }
   0xc   : > { %704 = vmatprep.subr.bf16.mxu0 %v760_v1  ;;  %710 = vmatprep.subr.bf16.mxu1 %v760_v1  ;;  %s676_s14 = sshll.u32 %s884_s13, 2  ;;  %v747_v4 = vld [vmem:[%s876_s3] sm:$0xff]   ;;  %vm428_vm2 = vcmask 261120   ;;  %v748_v20 = vld [vmem:[%s878_s5 + $0x8] sm:$0xff]   ;;  %s678_s19 = sshll.u32 %s884_s13, 3  ;;  %vm611_vm3 = vcmask 31744  }
   0xd   : > { %705 = vmatpush3.bf16.msra.mxu0 %v744_v0  ;;  %706 = vmatprep.mubr.msk.bf16.mxu0 %vm761_vm0, %v760_v1  ;;  %s328_s17 = scalar_lea.vmem %s873_s0, %s676_s14  ;;  %v344_v6 = vshrl.u32 %v343_v5, 7  ;;  %v341_v7 = vld [vmem:[%s875_s2] sm:$0x1]  ;;  %v750_v34 = vld [vmem:[%s880_s7 + $0x8] sm:$0xff]   ;;  %s334_s22 = scalar_lea.vmem %s882_s9, %s678_s19 }
   0xe   : > { %714 = vmatprep.mubr.msk.bf16.mxu1 %vm761_vm0, %v760_v1  ;;  %718 = vmatprep.subr.bf16.mxu0 %v760_v1  ;;  %v745_v2 = vld [vmem:[%s328_s17] sm:$0xff]   ;;  %v342_v8 = vunpack.c.l.bf16 %v341_v7 }
   0xf   : > { %711 = vmatpush3.bf16.msra.mxu1 %v746_v3  ;;  %v345_v9 = vsub.s32 0, %v344_v6  ;;  %v749_v21 = vld [vmem:[%s878_s5] sm:$0xff]  }
  0x10   : > { %707 = vmatmul.mubr.msk.bf16.vlgmr.msra.gmra.mxu0 %vm358_vm1, %v745_v2  ;;  %712 = vmatprep.subr.bf16.mxu1 %v760_v1  ;;  %v410_v22 = vld [vmem:[%s877_s4] sm:$0x1] }
  0x11   : > { %722 = vmatprep.mubr.msk.bf16.mxu0 %vm761_vm0, %v760_v1  ;;  %v346_v10 = vrot.slane %v342_v8, %v345_v9  ;;  %719 = vmatpush3.bf16.msra.mxu0 %v748_v20  ;;  %v411_v23 = vunpack.c.l.bf16 %v410_v22  ;;  %v751_v35 = vld [vmem:[%s880_s7] sm:$0xff]  }
  0x12   : > { %720 = vmatprep.subr.bf16.mxu0 %v760_v1  ;;  %v480_v36 = vld [vmem:[%s879_s6] sm:$0x1] }
  0x13   : > { %713 = vmatpush3.bf16.msra.mxu1 %v747_v4  ;;  %v415_v24 = vrot.slane %v411_v23, %v345_v9  ;;  %v481_v37 = vunpack.c.l.bf16 %v480_v36  ;;  %v549_v48 = vld [vmem:[%s881_s8] sm:$0x1] }
  0x14   : > { %726 = vmatprep.subr.bf16.mxu1 %v760_v1  ;;  %v550_v49 = vunpack.c.l.bf16 %v549_v48 }
  0x15   : > { %721 = vmatpush3.bf16.msra.mxu0 %v749_v21  ;;  %v485_v38 = vrot.slane %v481_v37, %v345_v9 }
  0x16   : > { %v554_v50 = vrot.slane %v550_v49, %v345_v9 }
  0xd0   : > { %v396_v11 = vpop.f32.mrf.mxu0 }
  0xd1   : > { %v397_v13 = vadd.f32 %v396_v11, %v346_v10 }
  0xd2   : > { %v708_v12 = vpop.f32.mrf.mxu0 }
  0xd3   : > { %v403_v17 = vmax.f32 %v397_v13, 0.0 }
  0xd4   : > { %v399_v14 = vpop.f32.mrf.mxu0 }
  0xd5   : > { %v400_v15 = vadd.f32 %v399_v14, %v346_v10 }
  0xd6   : > { %v709_v16 = vpop.f32.mrf.mxu0 }
  0xd7   : > { %v404_v18 = vmax.f32 %v400_v15, 0.0 }
  0xd9   : > { %v405_v19 = vpack.c.bf16 %v404_v18, %v403_v17 }
  0xdb   : > { %715 = vmatmul.mubr.msk.bf16.vlgmr.msra.gmra.mxu1 %vm428_vm2, %v405_v19 }
  0xdc   : > { %730 = vmatprep.mubr.msk.bf16.mxu1 %vm761_vm0, %v760_v1  ;;  %727 = vmatpush3.bf16.msra.mxu1 %v750_v34 }
  0xdd   : > { %728 = vmatprep.subr.bf16.mxu1 %v760_v1 }
  0xe0   : > { %729 = vmatpush3.bf16.msra.mxu1 %v751_v35 }
 0x19b   : > { %v466_v25 = vpop.f32.mrf.mxu1 }
 0x19c   : > { %v467_v27 = vadd.f32 %v466_v25, %v415_v24 }
 0x19d   : > { %v716_v26 = vpop.f32.mrf.mxu1 }
 0x19e   : > { %v473_v31 = vmax.f32 %v467_v27, 0.0 }
 0x19f   : > { %v469_v28 = vpop.f32.mrf.mxu1 }
 0x1a0   : > { %v470_v29 = vadd.f32 %v469_v28, %v415_v24 }
 0x1a1   : > { %v717_v30 = vpop.f32.mrf.mxu1 }
 0x1a2   : > { %v474_v32 = vmax.f32 %v470_v29, 0.0 }
 0x1a4   : > { %v475_v33 = vpack.c.bf16 %v474_v32, %v473_v31 }
 0x1a6   : > { %723 = vmatmul.mubr.msk.bf16.vlgmr.msra.gmra.mxu0 %vm428_vm2, %v475_v33 }
 0x266   : > { %v535_v39 = vpop.f32.mrf.mxu0 }
 0x267   : > { %v536_v41 = vadd.f32 %v535_v39, %v485_v38 }
 0x268   : > { %v724_v40 = vpop.f32.mrf.mxu0 }
 0x269   : > { %v542_v45 = vmax.f32 %v536_v41, 0.0 }
 0x26a   : > { %v538_v42 = vpop.f32.mrf.mxu0 }
 0x26b   : > { %v539_v43 = vadd.f32 %v538_v42, %v485_v38 }
 0x26c   : > { %v725_v44 = vpop.f32.mrf.mxu0 }
 0x26d   : > { %v543_v46 = vmax.f32 %v539_v43, 0.0 }
 0x26f   : > { %v544_v47 = vpack.c.bf16 %v543_v46, %v542_v45 }
 0x271   : > { %731 = vmatmul.mubr.msk.bf16.vlgmr.msra.gmra.mxu1 %vm428_vm2, %v544_v47 }
 0x331   : > { %v604_v51 = vpop.f32.mrf.mxu1 }
 0x332   : > { %v605_v52 = vadd.f32 %v604_v51, %v554_v50 }
 0x333   : > { %v732_v53 = vpop.f32.mrf.mxu1 }
 0x334   : > { %612 = vst.msk [vmem:[%s334_s22] sm:$0xff] %vm611_vm3, %v605_v52 }
 0x335   : > { %v607_v54 = vpop.f32.mrf.mxu1 }
 0x336   : > { %v608_v55 = vadd.f32 %v607_v54, %v554_v50 }
 0x337   : > { %v733_v56 = vpop.f32.mrf.mxu1 }
 0x338   : > { %613 = vst.msk [vmem:[%s334_s22 + $0x8] sm:$0xff] %vm611_vm3, %v608_v55 }
 0x339 PF: > { %s19_s30 = sadd.s32 1, %s758_s30  }
 0x33a   : > { %p16_p4 = scmp.ge.s32.totalorder %s19_s30, 4  }
 0x33c   :  { %18 = sbr.rel (!%p16_p4) target bundleno = 1 (0x1), region = 86 }

</bundles_post_ra>
